<compile_context>
chip_gen: v6e
topology: v6e:2x2x1
jax: 0.10.0
libtpu: 0.0.40
codegen_flags: <defaults>
</compile_context>

<pallas_src>
import jax
import jax.numpy as jnp
from jax.experimental import pallas as pl
from jax.experimental.pallas import tpu as pltpu

INPUT_DIM = 2
INDEX_DIM = 1
Y_DIM = 1
HIDDEN_DIM = 128
IN_FEATS = INPUT_DIM + INDEX_DIM + Y_DIM  # 4


def _swish(x):
    # sigmoid(x) * x == 0.5 * x * (1 + tanh(x/2)): one EUP tanh, no exact divide.
    return 0.5 * x * (1.0 + jnp.tanh(0.5 * x))


def _round_up(v, m):
    return ((v + m - 1) // m) * m


def _chip_config():
    """Pick numerics / tiling knobs from the local TPU generation."""
    kind = ""
    try:
        kind = jax.devices()[0].device_kind.lower()
    except Exception:
        pass
    is_v6_plus = ("v6" in kind) or ("v7" in kind)
    is_v7 = "v7" in kind
    return {
        # bf16 bias/swish path only where the VPU/EUP have bf16 (v6e/v7x);
        # v5e (and unknown chips) keep activations in f32.
        "use_bf16_act": is_v6_plus,
        # 128->2 final layer: MXU on v6e/v7x, VPU + lane-reduce on v5e.
        "mxu_final": is_v6_plus,
        # v7x has 2 TensorCores per chip -> want >=4 grid steps for per-core overlap.
        "min_grid_steps": 4 if is_v7 else 2,
    }


def make_mlp_kernel(use_bf16_act, mxu_final):
    act_dt = jnp.bfloat16 if use_bf16_act else jnp.float32

    def kernel(x_ref, t_ref, y_ref,
               w1_ref, b1_ref, w2_ref, b2_ref,
               w3_ref, b3_ref, w4_ref, b4_ref,
               o_ref):
        # ---- Layer 1 (K = 4): broadcast mul-adds on the VPU (no concat, no padded
        # contraction on the MXU). Pre-activation kept in f32; it's cheap.
        x = x_ref[...]                       # (tm, 2)  f32
        t = t_ref[...]                       # (tm, 1)  f32
        y = y_ref[...]                       # (tm, 1)  f32
        w1 = w1_ref[...]                     # (4, 128) f32
        h = (x[:, 0:1] * w1[0:1, :]
             + x[:, 1:2] * w1[1:2, :]
             + t * w1[2:3, :]
             + y * w1[3:4, :]
             + b1_ref[...])                  # (tm, 128) f32
        h = _swish(h.astype(act_dt))

        # ---- Hidden layers: MXU matmuls (bf16 operands, f32 accumulation).
        # Bias + swish fused into one expression per layer, in act_dt
        # (bf16 on v6e/v7x -> 2x packed VPU/EUP + halved VMEM intermediates).
        h = _swish(jnp.dot(h.astype(jnp.bfloat16), w2_ref[...],
                           preferred_element_type=jnp.float32).astype(act_dt)
                   + b2_ref[...])
        h = _swish(jnp.dot(h.astype(jnp.bfloat16), w3_ref[...],
                           preferred_element_type=jnp.float32).astype(act_dt)
                   + b3_ref[...])

        # ---- Output layer (128 -> 2)
        if mxu_final:
            out = jnp.dot(h.astype(jnp.bfloat16), w4_ref[...],
                          preferred_element_type=jnp.float32) + b4_ref[...]
        else:
            # Off the MXU (v5e): VPU multiplies + XLU lane reductions per column.
            hf = h.astype(jnp.float32)
            w4t = w4_ref[...]                                    # (2, 128) f32
            out0 = jnp.sum(hf * w4t[0:1, :], axis=-1, keepdims=True)
            out1 = jnp.sum(hf * w4t[1:2, :], axis=-1, keepdims=True)
            out = jnp.concatenate([out0, out1], axis=-1) + b4_ref[...]

        # (tm, 2) store: masked lanes but contiguous in HBM; negligible at tm >= 512.
        o_ref[...] = out.astype(o_ref.dtype)

    return kernel


def prepare_kernel_params(params, config=None):
    """One-time weight prep: hoists the bf16 casts out of the per-call wrapper."""
    cfg = config if config is not None else _chip_config()
    w1, b1, w2, b2, w3, b3, w4, b4 = params
    bf = jnp.bfloat16
    if cfg["use_bf16_act"]:
        return (w1, b1,
                w2.astype(bf), b2.astype(bf),
                w3.astype(bf), b3.astype(bf),
                w4.astype(bf), b4)                 # b4 stays f32 (added to f32 acc)
    # v5e path: biases stay f32, final layer pre-transposed to (2,128) for the VPU.
    return (w1, b1,
            w2.astype(bf), b2,
            w3.astype(bf), b3,
            jnp.transpose(w4), b4)


class PallasMLP:
    """Fused Pallas forward for MLP(input_dim=2, index_dim=1, hidden_dim=128)."""

    def __init__(self, params, *, tm=2048, config=None):
        self.cfg = config if config is not None else _chip_config()
        self.tm = int(tm)
        self.kparams = prepare_kernel_params(params, self.cfg)
        self.kernel = make_mlp_kernel(self.cfg["use_bf16_act"], self.cfg["mxu_final"])

    def __call__(self, inp, t, y):
        sz = inp.shape
        x = inp.reshape(-1, INPUT_DIM).astype(jnp.float32)
        tt = t.reshape(-1, INDEX_DIM).astype(jnp.float32)
        yy = y.reshape(-1, Y_DIM).astype(jnp.float32)
        N = x.shape[0]

        # Row tile: as large as requested (default 2048; sweep 1024-4096 for huge N),
        # multiple of 8, capped so the grid has >= min_grid_steps iterations.
        cap = _round_up(-(-N // self.cfg["min_grid_steps"]), 8)
        tm_eff = max(8, (min(self.tm, cap) // 8) * 8)

        n_pad = _round_up(N, tm_eff)
        if n_pad != N:
            pad = n_pad - N
            # TODO(synk): for latency-critical tiny batches, replace the pad with an
            # N scalar-prefetch + masked tail tile to avoid the extra XLA pad op.
            x = jnp.pad(x, ((0, pad), (0, 0)))
            tt = jnp.pad(tt, ((0, pad), (0, 0)))
            yy = jnp.pad(yy, ((0, pad), (0, 0)))

        grid = (n_pad // tm_eff,)

        def rows(width):
            return pl.BlockSpec((tm_eff, width), lambda i: (i, 0))

        def full(shape):
            return pl.BlockSpec(shape, lambda i, _s=shape: tuple(0 for _ in _s))

        weights = self.kparams
        flops = 2 * n_pad * (IN_FEATS * HIDDEN_DIM
                             + 2 * HIDDEN_DIM * HIDDEN_DIM
                             + HIDDEN_DIM * INPUT_DIM)
        transcendentals = 3 * n_pad * HIDDEN_DIM
        bytes_accessed = (x.size + tt.size + yy.size) * 4 + n_pad * INPUT_DIM * 4
        for p in weights:
            bytes_accessed += p.size * p.dtype.itemsize

        out = pl.pallas_call(
            self.kernel,
            out_shape=jax.ShapeDtypeStruct((n_pad, INPUT_DIM), jnp.float32),
            grid_spec=pltpu.PrefetchScalarGridSpec(
                num_scalar_prefetch=0,
                grid=grid,
                in_specs=[rows(INPUT_DIM), rows(INDEX_DIM), rows(Y_DIM)]
                         + [full(p.shape) for p in weights],
                out_specs=rows(INPUT_DIM),
            ),
            compiler_params=pltpu.CompilerParams(
                dimension_semantics=("parallel",),
                # Under the v7x per-core ceiling (~48 MiB of 64 MiB); ample for
                # tm up to 4096 with double-buffered row tiles + intermediates.
                vmem_limit_bytes=48 * 1024 * 1024),
            cost_estimate=pl.CostEstimate(
                flops=int(flops),
                transcendentals=int(transcendentals),
                bytes_accessed=int(bytes_accessed)),
        )(x, tt, yy, *weights)

        return out[:N].reshape(sz)


def init_params(key):
    """Deterministic param init (Kaiming-uniform-like, as in nn.Linear defaults)."""
    dims = [(IN_FEATS, HIDDEN_DIM),
            (HIDDEN_DIM, HIDDEN_DIM),
            (HIDDEN_DIM, HIDDEN_DIM),
            (HIDDEN_DIM, INPUT_DIM)]
    params = []
    for fan_in, fan_out in dims:
        key, kw, kb = jax.random.split(key, 3)
        bound = 1.0 / jnp.sqrt(fan_in)
        # stored as (in, out): PyTorch weight (out, in) transposed
        w = jax.random.uniform(kw, (fan_in, fan_out), jnp.float32, -bound, bound)
        b = jax.random.uniform(kb, (1, fan_out), jnp.float32, -bound, bound)
        params += [w, b]
    return tuple(params)


def mlp_reference_f32(params, inp, t, y):
    """Pure-f32 JAX reference (matches PyTorch semantics: sigmoid(x)*x swish)."""
    sz = inp.shape
    h = jnp.concatenate([inp.reshape(-1, INPUT_DIM).astype(jnp.float32),
                         t.reshape(-1, INDEX_DIM).astype(jnp.float32),
                         y.reshape(-1, Y_DIM).astype(jnp.float32)], axis=1)
    w1, b1, w2, b2, w3, b3, w4, b4 = params

    def swish(v):
        return jax.nn.sigmoid(v) * v

    x = swish(h @ w1 + b1)
    x = swish(x @ w2 + b2)
    x = swish(x @ w3 + b3)
    x = x @ w4 + b4
    return x.reshape(sz)


def mlp_reference_mixed(params, inp, t, y, *, config=None):
    """JAX reference mirroring the kernel numerics for the selected chip config."""
    cfg = config if config is not None else _chip_config()
    act_dt = jnp.bfloat16 if cfg["use_bf16_act"] else jnp.float32
    sz = inp.shape
    x = inp.reshape(-1, INPUT_DIM).astype(jnp.float32)
    tt = t.reshape(-1, INDEX_DIM).astype(jnp.float32)
    yy = y.reshape(-1, Y_DIM).astype(jnp.float32)
    w1, b1, w2, b2, w3, b3, w4, b4 = params

    h = (x[:, 0:1] * w1[0:1, :] + x[:, 1:2] * w1[1:2, :]
         + tt * w1[2:3, :] + yy * w1[3:4, :] + b1)
    h = _swish(h.astype(act_dt))
    for w, b in ((w2, b2), (w3, b3)):
        acc = jnp.dot(h.astype(jnp.bfloat16), w.astype(jnp.bfloat16),
                      preferred_element_type=jnp.float32)
        h = _swish(acc.astype(act_dt) + b.astype(act_dt))
    if cfg["mxu_final"]:
        out = jnp.dot(h.astype(jnp.bfloat16), w4.astype(jnp.bfloat16),
                      preferred_element_type=jnp.float32) + b4
    else:
        out = h.astype(jnp.float32) @ w4 + b4
    return out.reshape(sz)


if __name__ == "__main__":
    key = jax.random.PRNGKey(0)
    kp, ki, kt, ky, ki2, kt2, ky2 = jax.random.split(key, 7)

    params = init_params(kp)
    cfg = _chip_config()
    mlp = PallasMLP(params, tm=2048, config=cfg)

    # Case 1: small batch of 2-d samples, N = 64 rows (>= 2 grid steps).
    inp = jax.random.normal(ki, (4, 16, 2), jnp.float32)
    t = jax.random.uniform(kt, (64,), jnp.float32)
    y = jax.random.normal(ky, (64, 1), jnp.float32)

    out = jax.block_until_ready(mlp(inp, t, y))
    assert out.shape == inp.shape
    assert jnp.allclose(out, mlp_reference_mixed(params, inp, t, y, config=cfg),
                        atol=5e-3, rtol=5e-3), "mismatch vs mixed-precision reference"
    assert jnp.allclose(out, mlp_reference_f32(params, inp, t, y),
                        atol=5e-2, rtol=5e-2), "mismatch vs f32 reference"

    # Case 2: ragged row count (N = 35), exercises padding + output slice path.
    inp2 = jax.random.normal(ki2, (5, 7, 2), jnp.float32)
    t2 = jax.random.uniform(kt2, (35,), jnp.float32)
    y2 = jax.random.normal(ky2, (35, 1), jnp.float32)

    out2 = jax.block_until_ready(mlp(inp2, t2, y2))
    assert out2.shape == inp2.shape
    assert jnp.allclose(out2, mlp_reference_mixed(params, inp2, t2, y2, config=cfg),
                        atol=5e-3, rtol=5e-3), "mismatch vs mixed reference (ragged)"
    assert jnp.allclose(out2, mlp_reference_f32(params, inp2, t2, y2),
                        atol=5e-2, rtol=5e-2), "mismatch vs f32 reference (ragged)"

    print("KERNEL_OK")
</pallas_src>

<mosaic_0001>
module attributes {stable_mosaic.version = 11 : i64} {
  func.func @kernel(%arg0: i32, %arg1: memref<32x2xf32, #tpu.memory_space<vmem>>, %arg2: memref<32x1xf32, #tpu.memory_space<vmem>>, %arg3: memref<32x1xf32, #tpu.memory_space<vmem>>, %arg4: memref<4x128xf32, #tpu.memory_space<vmem>>, %arg5: memref<1x128xf32, #tpu.memory_space<vmem>>, %arg6: memref<128x128xbf16, #tpu.memory_space<vmem>>, %arg7: memref<1x128xf32, #tpu.memory_space<vmem>>, %arg8: memref<128x128xbf16, #tpu.memory_space<vmem>>, %arg9: memref<1x128xf32, #tpu.memory_space<vmem>>, %arg10: memref<2x128xf32, #tpu.memory_space<vmem>>, %arg11: memref<1x2xf32, #tpu.memory_space<vmem>>, %arg12: memref<32x2xf32, #tpu.memory_space<vmem>>) attributes {dimension_semantics = [#tpu.dimension_semantics<parallel>], iteration_bounds = array<i64: 2>, scalar_prefetch = 0 : i64, scratch_operands = 0 : i64, tpu.core_type = #tpu.core_type<tc>, window_params = [{transform_indices = @transform_0, window_bounds = array<i64: 32, 2>}, {transform_indices = @transform_1, window_bounds = array<i64: 32, 1>}, {transform_indices = @transform_2, window_bounds = array<i64: 32, 1>}, {pipeline_mode = #tpu.pipeline_mode<synchronous>, transform_indices = @transform_3, window_bounds = array<i64: 4, 128>}, {pipeline_mode = #tpu.pipeline_mode<synchronous>, transform_indices = @transform_4, window_bounds = array<i64: 1, 128>}, {pipeline_mode = #tpu.pipeline_mode<synchronous>, transform_indices = @transform_5, window_bounds = array<i64: 128, 128>}, {pipeline_mode = #tpu.pipeline_mode<synchronous>, transform_indices = @transform_6, window_bounds = array<i64: 1, 128>}, {pipeline_mode = #tpu.pipeline_mode<synchronous>, transform_indices = @transform_7, window_bounds = array<i64: 128, 128>}, {pipeline_mode = #tpu.pipeline_mode<synchronous>, transform_indices = @transform_8, window_bounds = array<i64: 1, 128>}, {pipeline_mode = #tpu.pipeline_mode<synchronous>, transform_indices = @transform_9, window_bounds = array<i64: 2, 128>}, {pipeline_mode = #tpu.pipeline_mode<synchronous>, transform_indices = @transform_10, window_bounds = array<i64: 1, 2>}, {transform_indices = @transform_11, window_bounds = array<i64: 32, 2>}]} {
    %c0 = arith.constant 0 : index
    %c0_0 = arith.constant 0 : index
    %0 = vector.load %arg1[%c0, %c0_0] : memref<32x2xf32, #tpu.memory_space<vmem>>, vector<32x2xf32>
    %c0_1 = arith.constant 0 : index
    %c0_2 = arith.constant 0 : index
    %1 = vector.load %arg2[%c0_1, %c0_2] : memref<32x1xf32, #tpu.memory_space<vmem>>, vector<32x1xf32>
    %c0_3 = arith.constant 0 : index
    %c0_4 = arith.constant 0 : index
    %2 = vector.load %arg3[%c0_3, %c0_4] : memref<32x1xf32, #tpu.memory_space<vmem>>, vector<32x1xf32>
    %c0_5 = arith.constant 0 : index
    %c0_6 = arith.constant 0 : index
    %3 = vector.load %arg4[%c0_5, %c0_6] : memref<4x128xf32, #tpu.memory_space<vmem>>, vector<4x128xf32>
    %4 = vector.extract_strided_slice %0 {offsets = [0, 0], sizes = [32, 1], strides = [1, 1]} : vector<32x2xf32> to vector<32x1xf32>
    %5 = vector.extract_strided_slice %3 {offsets = [0, 0], sizes = [1, 128], strides = [1, 1]} : vector<4x128xf32> to vector<1x128xf32>
    %6 = vector.broadcast %4 : vector<32x1xf32> to vector<32x128xf32>
    %7 = vector.broadcast %5 : vector<1x128xf32> to vector<32x128xf32>
    %8 = arith.mulf %6, %7 : vector<32x128xf32>
    %9 = vector.extract_strided_slice %0 {offsets = [0, 1], sizes = [32, 1], strides = [1, 1]} : vector<32x2xf32> to vector<32x1xf32>
    %10 = vector.extract_strided_slice %3 {offsets = [1, 0], sizes = [1, 128], strides = [1, 1]} : vector<4x128xf32> to vector<1x128xf32>
    %11 = vector.broadcast %9 : vector<32x1xf32> to vector<32x128xf32>
    %12 = vector.broadcast %10 : vector<1x128xf32> to vector<32x128xf32>
    %13 = arith.mulf %11, %12 : vector<32x128xf32>
    %14 = arith.addf %8, %13 : vector<32x128xf32>
    %15 = vector.extract_strided_slice %3 {offsets = [2, 0], sizes = [1, 128], strides = [1, 1]} : vector<4x128xf32> to vector<1x128xf32>
    %16 = vector.broadcast %1 : vector<32x1xf32> to vector<32x128xf32>
    %17 = vector.broadcast %15 : vector<1x128xf32> to vector<32x128xf32>
    %18 = arith.mulf %16, %17 : vector<32x128xf32>
    %19 = arith.addf %14, %18 : vector<32x128xf32>
    %20 = vector.extract_strided_slice %3 {offsets = [3, 0], sizes = [1, 128], strides = [1, 1]} : vector<4x128xf32> to vector<1x128xf32>
    %21 = vector.broadcast %2 : vector<32x1xf32> to vector<32x128xf32>
    %22 = vector.broadcast %20 : vector<1x128xf32> to vector<32x128xf32>
    %23 = arith.mulf %21, %22 : vector<32x128xf32>
    %24 = arith.addf %19, %23 : vector<32x128xf32>
    %c0_7 = arith.constant 0 : index
    %c0_8 = arith.constant 0 : index
    %25 = vector.load %arg5[%c0_7, %c0_8] : memref<1x128xf32, #tpu.memory_space<vmem>>, vector<1x128xf32>
    %26 = vector.broadcast %25 : vector<1x128xf32> to vector<32x128xf32>
    %27 = arith.addf %24, %26 : vector<32x128xf32>
    %cst = arith.constant 5.000000e-01 : f32
    %28 = vector.broadcast %cst : f32 to vector<32x128xf32>
    %29 = arith.mulf %28, %27 : vector<32x128xf32>
    %cst_9 = arith.constant 5.000000e-01 : f32
    %30 = vector.broadcast %cst_9 : f32 to vector<32x128xf32>
    %31 = arith.mulf %30, %27 : vector<32x128xf32>
    %32 = math.tanh %31 : vector<32x128xf32>
    %cst_10 = arith.constant 1.000000e+00 : f32
    %33 = vector.broadcast %cst_10 : f32 to vector<32x128xf32>
    %34 = arith.addf %33, %32 : vector<32x128xf32>
    %35 = arith.mulf %29, %34 : vector<32x128xf32>
    %36 = arith.truncf %35 : vector<32x128xf32> to vector<32x128xbf16>
    %c0_11 = arith.constant 0 : index
    %c0_12 = arith.constant 0 : index
    %37 = vector.load %arg6[%c0_11, %c0_12] : memref<128x128xbf16, #tpu.memory_space<vmem>>, vector<128x128xbf16>
    %cst_13 = arith.constant dense<0.000000e+00> : vector<32x128xf32>
    %38 = tpu.matmul %36, %37, %cst_13 {dimension_numbers = #tpu.dot_dimension_numbers<[1], [0], [0], [1], [0, 0, 1, 1], [], []>} : vector<32x128xbf16>, vector<128x128xbf16>, vector<32x128xf32> -> vector<32x128xf32>
    %c0_14 = arith.constant 0 : index
    %c0_15 = arith.constant 0 : index
    %39 = vector.load %arg7[%c0_14, %c0_15] : memref<1x128xf32, #tpu.memory_space<vmem>>, vector<1x128xf32>
    %40 = vector.broadcast %39 : vector<1x128xf32> to vector<32x128xf32>
    %41 = arith.addf %38, %40 : vector<32x128xf32>
    %cst_16 = arith.constant 5.000000e-01 : f32
    %42 = vector.broadcast %cst_16 : f32 to vector<32x128xf32>
    %43 = arith.mulf %42, %41 : vector<32x128xf32>
    %cst_17 = arith.constant 5.000000e-01 : f32
    %44 = vector.broadcast %cst_17 : f32 to vector<32x128xf32>
    %45 = arith.mulf %44, %41 : vector<32x128xf32>
    %46 = math.tanh %45 : vector<32x128xf32>
    %cst_18 = arith.constant 1.000000e+00 : f32
    %47 = vector.broadcast %cst_18 : f32 to vector<32x128xf32>
    %48 = arith.addf %47, %46 : vector<32x128xf32>
    %49 = arith.mulf %43, %48 : vector<32x128xf32>
    %50 = arith.truncf %49 : vector<32x128xf32> to vector<32x128xbf16>
    %c0_19 = arith.constant 0 : index
    %c0_20 = arith.constant 0 : index
    %51 = vector.load %arg8[%c0_19, %c0_20] : memref<128x128xbf16, #tpu.memory_space<vmem>>, vector<128x128xbf16>
    %cst_21 = arith.constant dense<0.000000e+00> : vector<32x128xf32>
    %52 = tpu.matmul %50, %51, %cst_21 {dimension_numbers = #tpu.dot_dimension_numbers<[1], [0], [0], [1], [0, 0, 1, 1], [], []>} : vector<32x128xbf16>, vector<128x128xbf16>, vector<32x128xf32> -> vector<32x128xf32>
    %c0_22 = arith.constant 0 : index
    %c0_23 = arith.constant 0 : index
    %53 = vector.load %arg9[%c0_22, %c0_23] : memref<1x128xf32, #tpu.memory_space<vmem>>, vector<1x128xf32>
    %54 = vector.broadcast %53 : vector<1x128xf32> to vector<32x128xf32>
    %55 = arith.addf %52, %54 : vector<32x128xf32>
    %cst_24 = arith.constant 5.000000e-01 : f32
    %56 = vector.broadcast %cst_24 : f32 to vector<32x128xf32>
    %57 = arith.mulf %56, %55 : vector<32x128xf32>
    %cst_25 = arith.constant 5.000000e-01 : f32
    %58 = vector.broadcast %cst_25 : f32 to vector<32x128xf32>
    %59 = arith.mulf %58, %55 : vector<32x128xf32>
    %60 = math.tanh %59 : vector<32x128xf32>
    %cst_26 = arith.constant 1.000000e+00 : f32
    %61 = vector.broadcast %cst_26 : f32 to vector<32x128xf32>
    %62 = arith.addf %61, %60 : vector<32x128xf32>
    %63 = arith.mulf %57, %62 : vector<32x128xf32>
    %c0_27 = arith.constant 0 : index
    %c0_28 = arith.constant 0 : index
    %64 = vector.load %arg10[%c0_27, %c0_28] : memref<2x128xf32, #tpu.memory_space<vmem>>, vector<2x128xf32>
    %65 = vector.extract_strided_slice %64 {offsets = [0, 0], sizes = [1, 128], strides = [1, 1]} : vector<2x128xf32> to vector<1x128xf32>
    %66 = vector.broadcast %65 : vector<1x128xf32> to vector<32x128xf32>
    %67 = arith.mulf %63, %66 : vector<32x128xf32>
    %cst_29 = arith.constant dense<0.000000e+00> : vector<32xf32>
    %68 = vector.multi_reduction <add>, %67, %cst_29 [1] : vector<32x128xf32> to vector<32xf32>
    %69 = vector.shape_cast %68 : vector<32xf32> to vector<32x1xf32>
    %70 = vector.extract_strided_slice %64 {offsets = [1, 0], sizes = [1, 128], strides = [1, 1]} : vector<2x128xf32> to vector<1x128xf32>
    %71 = vector.broadcast %70 : vector<1x128xf32> to vector<32x128xf32>
    %72 = arith.mulf %63, %71 : vector<32x128xf32>
    %cst_30 = arith.constant dense<0.000000e+00> : vector<32xf32>
    %73 = vector.multi_reduction <add>, %72, %cst_30 [1] : vector<32x128xf32> to vector<32xf32>
    %74 = vector.shape_cast %73 : vector<32xf32> to vector<32x1xf32>
    %75 = tpu.concatenate %69, %74 in 1 : vector<32x1xf32>, vector<32x1xf32> -> vector<32x2xf32>
    %c0_31 = arith.constant 0 : index
    %c0_32 = arith.constant 0 : index
    %76 = vector.load %arg11[%c0_31, %c0_32] : memref<1x2xf32, #tpu.memory_space<vmem>>, vector<1x2xf32>
    %77 = vector.broadcast %76 : vector<1x2xf32> to vector<32x2xf32>
    %78 = arith.addf %75, %77 : vector<32x2xf32>
    %c0_33 = arith.constant 0 : index
    %c0_34 = arith.constant 0 : index
    %79 = vector.load %arg12[%c0_33, %c0_34] : memref<32x2xf32, #tpu.memory_space<vmem>>, vector<32x2xf32>
    tpu.vector_store %arg12[%c0_33, %c0_34], %78 {strides = array<i32>} : memref<32x2xf32, #tpu.memory_space<vmem>>, vector<32x2xf32>,
    return
  }
  func.func @transform_0(%arg0: i32) -> (i32, i32) {
    %c0_i32 = arith.constant 0 : i32
    %c0_i32_0 = arith.constant 0 : i32
    return %arg0, %c0_i32 : i32, i32
  }
  func.func @transform_1(%arg0: i32) -> (i32, i32) {
    %c0_i32 = arith.constant 0 : i32
    %c0_i32_0 = arith.constant 0 : i32
    return %arg0, %c0_i32 : i32, i32
  }
  func.func @transform_2(%arg0: i32) -> (i32, i32) {
    %c0_i32 = arith.constant 0 : i32
    %c0_i32_0 = arith.constant 0 : i32
    return %arg0, %c0_i32 : i32, i32
  }
  func.func @transform_3(%arg0: i32) -> (i32, i32) {
    %c0_i32 = arith.constant 0 : i32
    %c0_i32_0 = arith.constant 0 : i32
    %c0_i32_1 = arith.constant 0 : i32
    return %c0_i32, %c0_i32_0 : i32, i32
  }
  func.func @transform_4(%arg0: i32) -> (i32, i32) {
    %c0_i32 = arith.constant 0 : i32
    %c0_i32_0 = arith.constant 0 : i32
    %c0_i32_1 = arith.constant 0 : i32
    return %c0_i32, %c0_i32_0 : i32, i32
  }
  func.func @transform_5(%arg0: i32) -> (i32, i32) {
    %c0_i32 = arith.constant 0 : i32
    %c0_i32_0 = arith.constant 0 : i32
    %c0_i32_1 = arith.constant 0 : i32
    return %c0_i32, %c0_i32_0 : i32, i32
  }
  func.func @transform_6(%arg0: i32) -> (i32, i32) {
    %c0_i32 = arith.constant 0 : i32
    %c0_i32_0 = arith.constant 0 : i32
    %c0_i32_1 = arith.constant 0 : i32
    return %c0_i32, %c0_i32_0 : i32, i32
  }
  func.func @transform_7(%arg0: i32) -> (i32, i32) {
    %c0_i32 = arith.constant 0 : i32
    %c0_i32_0 = arith.constant 0 : i32
    %c0_i32_1 = arith.constant 0 : i32
    return %c0_i32, %c0_i32_0 : i32, i32
  }
  func.func @transform_8(%arg0: i32) -> (i32, i32) {
    %c0_i32 = arith.constant 0 : i32
    %c0_i32_0 = arith.constant 0 : i32
    %c0_i32_1 = arith.constant 0 : i32
    return %c0_i32, %c0_i32_0 : i32, i32
  }
  func.func @transform_9(%arg0: i32) -> (i32, i32) {
    %c0_i32 = arith.constant 0 : i32
    %c0_i32_0 = arith.constant 0 : i32
    %c0_i32_1 = arith.constant 0 : i32
    return %c0_i32, %c0_i32_0 : i32, i32
  }
  func.func @transform_10(%arg0: i32) -> (i32, i32) {
    %c0_i32 = arith.constant 0 : i32
    %c0_i32_0 = arith.constant 0 : i32
    %c0_i32_1 = arith.constant 0 : i32
    return %c0_i32, %c0_i32_0 : i32, i32
  }
  func.func @transform_11(%arg0: i32) -> (i32, i32) {
    %c0_i32 = arith.constant 0 : i32
    %c0_i32_0 = arith.constant 0 : i32
    return %arg0, %c0_i32 : i32, i32
  }
}

</mosaic_0001>

<bundles_post_ra>
// kernel: tpu_custom_call.1
= control target key start
LH: loop header
LB: loop body
LE: loop exit
PB: predicated region body
PF: predicated region fallthrough
CT: control target
= control target key end

     0   :  { %s1227_s17 = smov 0   ;;  %s1344_s0 = inlined_call_operand.vmem [shape: f32[64,2], index: 0, kind: input, shape index: {}]   ;;  %s1345_s1 = inlined_call_operand.vmem [shape: f32[64,1], index: 1, kind: input, shape index: {}]   ;;  %s1346_s2 = inlined_call_operand.vmem [shape: f32[64,1], index: 2, kind: input, shape index: {}]   ;;  %s1347_s3 = inlined_call_operand.vmem [shape: f32[4,128], index: 3, kind: input, shape index: {}]   ;;  %s1348_s4 = inlined_call_operand.vmem [shape: f32[1,128], index: 4, kind: input, shape index: {}]   ;;  %s1349_s5 = inlined_call_operand.vmem [shape: bf16[128,128], index: 5, kind: input, shape index: {}]   ;;  %s1350_s6 = inlined_call_operand.vmem [shape: f32[1,128], index: 6, kind: input, shape index: {}]   ;;  %s1351_s7 = inlined_call_operand.vmem [shape: bf16[128,128], index: 7, kind: input, shape index: {}]   ;;  %s1352_s8 = inlined_call_operand.vmem [shape: f32[1,128], index: 8, kind: input, shape index: {}]   ;;  %s1353_s9 = inlined_call_operand.vmem [shape: f32[2,128], index: 9, kind: input, shape index: {}]   ;;  %s1354_s10 = inlined_call_operand.vmem [shape: f32[1,2], index: 10, kind: input, shape index: {}]   ;;  %s1355_s11 = inlined_call_operand.vmem [shape: f32[64,2], index: 11, kind: output, shape index: {}]  }
   0x1 LB: > { %s1005_s18 = sadd.s32 4294967295, %s1163_s17   ;;  %p1009_p0 = scmp.ge.s32.totalorder %s1163_s17, 1  ;;  %s1163_s17 = sphi %s1227_s17, %s21_s17  }
   0x2   : > { %p360_p1 = scmp.lt.s32.totalorder %s1163_s17, 3 }
   0x4   : > { %p361_p2 = pnand %p1009_p0, %p360_p1 }
   0x5   : > { %s1010_s19 = sshll.u32 (!%p361_p2), %s1005_s18, 2 }
   0x6   : > { %364 = sbr.rel (%p361_p2) target bundleno = 801 (0x321), region = 64  ;;  %p411_p3 = scmp.lt.s32.totalorder (!%p361_p2), %s1010_s19, 7 }
   0xb   : > { %v1165_v0 = vmov 1   ;;  %v1166_v1 = vmov 0   ;;  %s1357_s19 = smov (!%p411_p3, %s1010_s19), 7  ;;  %v1117_v12 = vld [vmem:[%s1349_s5 + $0x38] sm:$0xff]   ;;  %v1118_v14 = vld [vmem:[%s1349_s5 + $0x30] sm:$0xff]   ;;  %v1119_v16 = vld [vmem:[%s1349_s5 + $0x28] sm:$0xff]   ;;  %v468_v22 = vlaneseq }
   0xc   : > { %1111 = vset.pattern.permute.xlu1 %v1165_v0  ;;  %1110 = vset.pattern.permute.xlu0 %v1166_v1  ;;  %s1235_s20 = sshll.u32 %s1357_s19, 3  ;;  %v1120_v17 = vld [vmem:[%s1349_s5 + $0x20] sm:$0xff]   ;;  %v1121_v18 = vld [vmem:[%s1349_s5 + $0x18] sm:$0xff]   ;;  %v1122_v19 = vld [vmem:[%s1349_s5 + $0x10] sm:$0xff]   ;;  %vm904_vm0 = vcmask 7168   ;;  %vm920_vm1 = vcmask 15360  }
   0xd   : > { %s414_s23 = scalar_lea.vmem %s1344_s0, %s1235_s20  ;;  %s420_s26 = scalar_lea.vmem %s1345_s1, %s1235_s20  ;;  %1060 = vmatprep.subr.bf16.mxu0 %v1117_v12  ;;  %v1123_v20 = vld [vmem:[%s1349_s5 + $0x8] sm:$0xff]   ;;  %v1124_v21 = vld [vmem:[%s1349_s5] sm:$0xff]   ;;  %v1273_v25 = vshrl.u32 %v468_v22, 7 }
   0xe   : > { %v435_v2 = vld [vmem:[%s414_s23] sm:$0xff]  ;;  %v436_v3 = vld [vmem:[%s414_s23 + $0x8] sm:$0xff]  ;;  %v437_v4 = vld [vmem:[%s414_s23 + $0x10] sm:$0xff]  ;;  %s426_s29 = scalar_lea.vmem %s1346_s2, %s1235_s20  ;;  %1061 = vmatpush3.bf16.msra.mxu0 %v1117_v12  ;;  %s432_s25 = scalar_lea.vmem %s1355_s11, %s1235_s20 }
   0xf   : > { %477 = vperm.xlu1 %1111, %v435_v2   ;;  %450 = vperm.xlu0 %1110, %v435_v2   ;;  %v438_v5 = vld [vmem:[%s414_s23 + $0x18] sm:$0xff]  ;;  %v440_v6 = vld [vmem:[%s420_s26 + $0x8] sm:$0xff]  ;;  %v439_v7 = vld [vmem:[%s420_s26] sm:$0xff]  ;;  %v494_v28 = vsub.s32 1, %v1273_v25  ;;  %v470_v29 = vsub.s32 0, %v1273_v25  ;;  %v526_v35 = vsub.s32 2, %v1273_v25 }
  0x10   : > { %v443_v8 = vld [vmem:[%s426_s29] sm:$0xff]  ;;  %v441_v9 = vld [vmem:[%s420_s26 + $0x10] sm:$0xff]  ;;  %v442_v11 = vld [vmem:[%s420_s26 + $0x18] sm:$0xff]  ;;  %1062 = vmatprep.subr.bf16.mxu0 %v1118_v14  ;;  %v558_v38 = vsub.s32 3, %v1273_v25 }
  0x11   : > { %v445_v10 = vld [vmem:[%s426_s29 + $0x10] sm:$0xff]  ;;  %v444_v13 = vld [vmem:[%s426_s29 + $0x8] sm:$0xff]  ;;  %v446_v15 = vld [vmem:[%s426_s29 + $0x18] sm:$0xff] }
  0x12   : > { %1063 = vmatpush3.bf16.msra.mxu0 %v1118_v14  ;;  %v447_v30 = vld [vmem:[%s1347_s3] sm:$0xf] }
  0x13   : > { %481 = vperm.xlu1 %1111, %v436_v3   ;;  %1113 = vset.pattern.permute.xlu0 %v1165_v0  ;;  %v495_v33 = vrot.slane %v447_v30, %v494_v28  ;;  %v471_v34 = vrot.slane %v447_v30, %v470_v29  ;;  %v527_v41 = vrot.slane %v447_v30, %v526_v35  ;;  %v1018_v56 = vld [vmem:[%s1348_s4] ss:$0 sm:$0xff] }
  0x14   : > { %485 = vperm.xlu0 %1113, %v437_v4   ;;  %1064 = vmatprep.subr.bf16.mxu0 %v1119_v16  ;;  %v559_v44 = vrot.slane %v447_v30, %v558_v38 }
  0x16   : > { %1065 = vmatpush3.bf16.msra.mxu0 %v1119_v16 }
  0x17   : > { %1112 = vset.pattern.permute.xlu1 %v1166_v1  ;;  %1066 = vmatprep.subr.bf16.mxu0 %v1120_v17 }
  0x18   : > { %465 = vperm.xlu1 %1112, %v438_v5   ;;  %1114 = vset.pattern.permute.xlu0 %v1166_v1 }
  0x19   : > { %455 = vperm.xlu0 %1114, %v436_v3  }
  0x1a   : > { %1067 = vmatpush3.bf16.msra.mxu0 %v1120_v17 }
  0x1b   : > { %1068 = vmatprep.subr.bf16.mxu0 %v1121_v18 }
  0x1c   : > { %1115 = vset.pattern.permute.xlu1 %v1165_v0 }
  0x1d   : > { %489 = vperm.xlu1 %1115, %v438_v5   ;;  %460 = vperm.xlu0 %1114, %v437_v4  }
  0x1e   : > { %1069 = vmatpush3.bf16.msra.mxu0 %v1121_v18 }
  0x1f   : > { %1070 = vmatprep.subr.bf16.mxu0 %v1122_v19 }
  0x21   : > { %1116 = vset.pattern.permute.xlu1 %v1166_v1  ;;  %511 = vperm.xlu0 %1114, %v440_v6  }
  0x22   : > { %506 = vperm.xlu1 %1116, %v439_v7   ;;  %1071 = vmatpush3.bf16.msra.mxu0 %v1122_v19 }
  0x23   : > { %1072 = vmatprep.subr.bf16.mxu0 %v1123_v20 }
  0x25   : > { %538 = vperm.xlu0 %1114, %v443_v8  }
  0x26   : > { %516 = vperm.xlu1 %1116, %v441_v9   ;;  %1073 = vmatpush3.bf16.msra.mxu0 %v1123_v20 }
  0x27   : > { %1074 = vmatprep.subr.bf16.mxu0 %v1124_v21 }
  0x29   : > { %548 = vperm.xlu0 %1114, %v445_v10  }
  0x2a   : > { %521 = vperm.xlu1 %1116, %v442_v11   ;;  %1075 = vmatpush3.bf16.msra.mxu0 %v1124_v21 }
  0x2e   : > { %543 = vperm.xlu1 %1116, %v444_v13  }
  0x32   : > { %553 = vperm.xlu1 %1116, %v446_v15  }
  0x8a   : > { %v478_v23 = vpop.permute.xlu1 %477  ;;  %v451_v24 = vpop.permute.xlu0 %450 }
  0x8b   : > { %v496_v39 = vmul.f32 %v495_v33, %v478_v23  ;;  %v472_v40 = vmul.f32 %v471_v34, %v451_v24 }
  0x8d   : > { %v500_v45 = vadd.f32 %v496_v39, %v472_v40  ;;  %v1125_v39 = vld [vmem:[%s1351_s7 + $0x38] sm:$0xff]   ;;  %v1126_v40 = vld [vmem:[%s1351_s7 + $0x30] sm:$0xff]  }
  0x8e   : > { %v482_v26 = vpop.permute.xlu1 %481  ;;  %1080 = vmatprep.subr.bf16.mxu1 %v1125_v39 }
  0x8f   : > { %v486_v27 = vpop.permute.xlu0 %485  ;;  %v497_v62 = vmul.f32 %v495_v33, %v482_v26  ;;  %1081 = vmatpush3.bf16.msra.mxu1 %v1125_v39 }
  0x90   : > { %v498_v46 = vmul.f32 %v495_v33, %v486_v27  ;;  %1082 = vmatprep.subr.bf16.mxu1 %v1126_v40 }
  0x93   : > { %v466_v31 = vpop.permute.xlu1 %465  ;;  %1083 = vmatpush3.bf16.msra.mxu1 %v1126_v40 }
  0x94   : > { %v456_v32 = vpop.permute.xlu0 %455  ;;  %v475_v4 = vmul.f32 %v471_v34, %v466_v31 }
  0x95   : > { %v473_v57 = vmul.f32 %v471_v34, %v456_v32 }
  0x97   : > { %v501_v2 = vadd.f32 %v497_v62, %v473_v57 }
  0x98   : > { %v490_v36 = vpop.permute.xlu1 %489  ;;  %v461_v37 = vpop.permute.xlu0 %460 }
  0x99   : > { %v474_v47 = vmul.f32 %v471_v34, %v461_v37  ;;  %v499_v3 = vmul.f32 %v495_v33, %v490_v36 }
  0x9b   : > { %v502_v53 = vadd.f32 %v498_v46, %v474_v47  ;;  %v503_v11 = vadd.f32 %v499_v3, %v475_v4  ;;  %v1132_v46 = vld [vmem:[%s1351_s7] sm:$0xff]  }
  0x9c   : > { %v512_v42 = vpop.permute.xlu0 %511  ;;  %v1019_v47 = vld [vmem:[%s1350_s6] ss:$0 sm:$0xff] }
  0x9d   : > { %v507_v43 = vpop.permute.xlu1 %506  ;;  %v529_v63 = vmul.f32 %v527_v41, %v512_v42  ;;  %v1128_v42 = vld [vmem:[%s1351_s7 + $0x20] sm:$0xff]  }
  0x9e   : > { %v528_v48 = vmul.f32 %v527_v41, %v507_v43  ;;  %v1129_v43 = vld [vmem:[%s1351_s7 + $0x18] sm:$0xff]  }
  0x9f   : > { %v533_v7 = vadd.f32 %v529_v63, %v501_v2 }
  0xa0   : > { %v532_v49 = vadd.f32 %v528_v48, %v500_v45  ;;  %v539_v50 = vpop.permute.xlu0 %538  ;;  %v1131_v45 = vld [vmem:[%s1351_s7 + $0x8] sm:$0xff]  }
  0xa1   : > { %v560_v51 = vmul.f32 %v559_v44, %v539_v50  ;;  %v517_v52 = vpop.permute.xlu1 %516 }
  0xa2   : > { %v530_v54 = vmul.f32 %v527_v41, %v517_v52 }
  0xa3   : > { %v564_v55 = vadd.f32 %v560_v51, %v532_v49 }
  0xa4   : > { %v534_v58 = vadd.f32 %v530_v54, %v502_v53  ;;  %v549_v59 = vpop.permute.xlu0 %548 }
  0xa5   : > { %v562_v60 = vmul.f32 %v559_v44, %v549_v59  ;;  %v522_v61 = vpop.permute.xlu1 %521  ;;  %v575_v0 = vadd.f32 %v1018_v56, %v564_v55 }
  0xa6   : > { %v531_v8 = vmul.f32 %v527_v41, %v522_v61  ;;  %v1127_v41 = vld [vmem:[%s1351_s7 + $0x28] sm:$0xff]  }
  0xa7   : > { %v566_v1 = vadd.f32 %v562_v60, %v534_v58  ;;  %v579_v10 = vmul.f32 0.5, %v575_v0  ;;  %1084 = vmatprep.subr.bf16.mxu1 %v1127_v41 }
  0xa8   : > { %v535_v15 = vadd.f32 %v531_v8, %v503_v11  ;;  %1085 = vmatpush3.bf16.msra.mxu1 %v1127_v41 }
  0xa9   : > { %v577_v5 = vadd.f32 %v1018_v56, %v566_v1  ;;  %v544_v6 = vpop.permute.xlu1 %543  ;;  %1133 = vtanh.f32 %v579_v10  ;;  %1086 = vmatprep.subr.bf16.mxu1 %v1128_v42 }
  0xaa   : > { %v561_v9 = vmul.f32 %v559_v44, %v544_v6 }
  0xab   : > { %v581_v13 = vmul.f32 0.5, %v577_v5 }
  0xac   : > { %v565_v12 = vadd.f32 %v561_v9, %v533_v7  ;;  %1087 = vmatpush3.bf16.msra.mxu1 %v1128_v42 }
  0xad   : > { %v554_v14 = vpop.permute.xlu1 %553  ;;  %1135 = vtanh.f32 %v581_v13  ;;  %1088 = vmatprep.subr.bf16.mxu1 %v1129_v43 }
  0xae   : > { %v563_v16 = vmul.f32 %v559_v44, %v554_v14  ;;  %v576_v17 = vadd.f32 %v1018_v56, %v565_v12  ;;  %v1130_v44 = vld [vmem:[%s1351_s7 + $0x10] sm:$0xff]  }
  0xb0   : > { %v567_v18 = vadd.f32 %v563_v16, %v535_v15  ;;  %v580_v19 = vmul.f32 0.5, %v576_v17  ;;  %1089 = vmatpush3.bf16.msra.mxu1 %v1129_v43 }
  0xb1   : > { %1090 = vmatprep.subr.bf16.mxu1 %v1130_v44 }
  0xb2   : > { %v578_v20 = vadd.f32 %v1018_v56, %v567_v18  ;;  %1137 = vtanh.f32 %v580_v19 }
  0xb4   : > { %v582_v21 = vmul.f32 0.5, %v578_v20  ;;  %1091 = vmatpush3.bf16.msra.mxu1 %v1130_v44 }
  0xb5   : > { %1092 = vmatprep.subr.bf16.mxu1 %v1131_v45 }
  0xb6   : > { %1139 = vtanh.f32 %v582_v21  ;;  %v1134_v22 = vpop.eup %1133 }
  0xb7   : > { %v587_v24 = vadd.f32 1.0, %v1134_v22 }
  0xb8   : > { %1093 = vmatpush3.bf16.msra.mxu1 %v1131_v45 }
  0xb9   : > { %v591_v30 = vmul.f32 %v587_v24, %v579_v10  ;;  %1094 = vmatprep.subr.bf16.mxu1 %v1132_v46  ;;  %v1028_v10 = vld [vmem:[%s1352_s8] ss:$0 sm:$0xff] }
  0xba   : > { %v1136_v23 = vpop.eup %1135 }
  0xbb   : > { %v589_v32 = vadd.f32 1.0, %v1136_v23  ;;  %v871_v23 = vld [vmem:[%s1353_s9] sm:$0x3] }
  0xbc   : > { %1095 = vmatpush3.bf16.msra.mxu1 %v1132_v46 }
  0xbd   : > { %v593_v36 = vmul.f32 %v589_v32, %v581_v13 }
  0xbf   : > { %v1138_v26 = vpop.eup %1137 }
  0xc0   : > { %v588_v27 = vadd.f32 1.0, %v1138_v26 }
  0xc2   : > { %v592_v31 = vmul.f32 %v588_v27, %v580_v19  ;;  %v891_v27 = vrot.slane %v871_v23, %v494_v28 }
  0xc3   : > { %v1140_v33 = vpop.eup %1139 }
  0xc4   : > { %v595_v34 = vpack.c.bf16 %v592_v31, %v591_v30  ;;  %v590_v35 = vadd.f32 1.0, %v1140_v33  ;;  %v875_v30 = vrot.slane %v871_v23, %v470_v29 }
  0xc6   : > { %1076 = vmatprep.mubr.bf16.mxu0 %v595_v34  ;;  %v594_v37 = vmul.f32 %v590_v35, %v582_v21 }
  0xc8   : > { %v596_v38 = vpack.c.bf16 %v594_v37, %v593_v36 }
  0xca   : > { %1077 = vmatmul.mubr.bf16.vlgmr.msra.gmra.mxu0 %v596_v38 }
 0x18a   : > { %v1078_v48 = vpop.f32.mrf.mxu0 }
 0x18b   : > { %v711_v49 = vadd.f32 %v1078_v48, %v1019_v47 }
 0x18c   : > { %v702_v50 = vpop.f32.mrf.mxu0 }
 0x18d   : > { %v703_v51 = vadd.f32 %v1019_v47, %v702_v50  ;;  %v719_v52 = vmul.f32 0.5, %v711_v49  ;;  %v1037_v50 = vld [vmem:[%s1354_s10] ss:$0 sm:$0xff] }
 0x18e   : > { %v1079_v53 = vpop.f32.mrf.mxu0 }
 0x18f   : > { %v717_v54 = vmul.f32 0.5, %v703_v51  ;;  %v714_v55 = vadd.f32 %v1079_v53, %v1019_v47 }
 0x190   : > { %v705_v56 = vpop.f32.mrf.mxu0 }
 0x191   : > { %1141 = vtanh.f32 %v717_v54  ;;  %v720_v57 = vmul.f32 0.5, %v714_v55  ;;  %v706_v58 = vadd.f32 %v1019_v47, %v705_v56 }
 0x192   : > { %1143 = vtanh.f32 %v719_v52 }
 0x193   : > { %1145 = vtanh.f32 %v720_v57  ;;  %v718_v59 = vmul.f32 0.5, %v706_v58 }
 0x195   : > { %1147 = vtanh.f32 %v718_v59 }
 0x19e   : > { %v1142_v60 = vpop.eup %1141 }
 0x19f   : > { %v1144_v61 = vpop.eup %1143  ;;  %v725_v0 = vadd.f32 1.0, %v1142_v60 }
 0x1a0   : > { %v1146_v62 = vpop.eup %1145  ;;  %v727_v2 = vadd.f32 1.0, %v1144_v61 }
 0x1a1   : > { %v728_v63 = vadd.f32 1.0, %v1146_v62  ;;  %v729_v5 = vmul.f32 %v725_v0, %v717_v54 }
 0x1a2   : > { %v1148_v1 = vpop.eup %1147  ;;  %v731_v7 = vmul.f32 %v727_v2, %v719_v52 }
 0x1a3   : > { %v726_v3 = vadd.f32 1.0, %v1148_v1  ;;  %v732_v4 = vmul.f32 %v728_v63, %v720_v57 }
 0x1a5   : > { %v730_v6 = vmul.f32 %v726_v3, %v718_v59  ;;  %v734_v9 = vpack.c.bf16 %v732_v4, %v731_v7 }
 0x1a7   : > { %v733_v8 = vpack.c.bf16 %v730_v6, %v729_v5 }
 0x1a9   : > { %1096 = vmatprep.mubr.bf16.mxu1 %v733_v8 }
 0x1aa   : > { %1097 = vmatmul.mubr.bf16.vlgmr.msra.gmra.mxu1 %v734_v9 }
 0x26a   : > { %v1098_v11 = vpop.f32.mrf.mxu1 }
 0x26b   : > { %v849_v12 = vadd.f32 %v1098_v11, %v1028_v10 }
 0x26c   : > { %v840_v13 = vpop.f32.mrf.mxu1 }
 0x26d   : > { %v857_v14 = vmul.f32 0.5, %v849_v12  ;;  %v841_v15 = vadd.f32 %v1028_v10, %v840_v13 }
 0x26e   : > { %v1099_v16 = vpop.f32.mrf.mxu1 }
 0x26f   : > { %1149 = vtanh.f32 %v857_v14  ;;  %v855_v17 = vmul.f32 0.5, %v841_v15  ;;  %v852_v18 = vadd.f32 %v1099_v16, %v1028_v10 }
 0x270   : > { %v843_v19 = vpop.f32.mrf.mxu1 }
 0x271   : > { %1151 = vtanh.f32 %v855_v17  ;;  %v858_v20 = vmul.f32 0.5, %v852_v18  ;;  %v844_v21 = vadd.f32 %v1028_v10, %v843_v19 }
 0x273   : > { %1153 = vtanh.f32 %v858_v20  ;;  %v856_v22 = vmul.f32 0.5, %v844_v21 }
 0x275   : > { %1155 = vtanh.f32 %v856_v22 }
 0x27c   : > { %v1150_v24 = vpop.eup %1149 }
 0x27d   : > { %v865_v26 = vadd.f32 1.0, %v1150_v24 }
 0x27e   : > { %v1152_v31 = vpop.eup %1151 }
 0x27f   : > { %v869_v32 = vmul.f32 %v865_v26, %v857_v14  ;;  %v863_v33 = vadd.f32 1.0, %v1152_v31 }
 0x280   : > { %v1154_v34 = vpop.eup %1153 }
 0x281   : > { %v867_v35 = vmul.f32 %v863_v33, %v855_v17  ;;  %v866_v36 = vadd.f32 1.0, %v1154_v34  ;;  %v894_v37 = vmul.f32 %v891_v27, %v869_v32  ;;  %v878_v38 = vmul.f32 %v875_v30, %v869_v32 }
 0x282   : > { %v1156_v39 = vpop.eup %1155 }
 0x283   : > { %v864_v40 = vadd.f32 1.0, %v1156_v39  ;;  %900 = vadd.xlane.f32.xlu0 %v894_v37  ;;  %884 = vadd.xlane.f32.xlu1 %v878_v38  ;;  %v870_v41 = vmul.f32 %v866_v36, %v858_v20  ;;  %v892_v43 = vmul.f32 %v891_v27, %v867_v35  ;;  %v876_v44 = vmul.f32 %v875_v30, %v867_v35 }
 0x285   : > { %v868_v42 = vmul.f32 %v864_v40, %v856_v22  ;;  %v879_v25 = vmul.f32 %v875_v30, %v870_v41  ;;  %v895_v45 = vmul.f32 %v891_v27, %v870_v41 }
 0x287   : > { %896 = vadd.xlane.f32.xlu1 %v892_v43  ;;  %880 = vadd.xlane.f32.xlu0 %v876_v44  ;;  %v877_v28 = vmul.f32 %v875_v30, %v868_v42  ;;  %v893_v29 = vmul.f32 %v891_v27, %v868_v42 }
 0x28b   : > { %886 = vadd.xlane.f32.xlu1 %v879_v25  ;;  %882 = vadd.xlane.f32.xlu0 %v877_v28 }
 0x28f   : > { %898 = vadd.xlane.f32.xlu0 %v893_v29 }
 0x293   : > { %902 = vadd.xlane.f32.xlu0 %v895_v45 }
 0x30c   : > { %v901_v46 = vpop.xlane.xlu0 %900  ;;  %v885_v47 = vpop.xlane.xlu1 %884 }
 0x30d   : > { %v907_v54 = vsel %vm904_vm0, %v885_v47, %v901_v46 }
 0x30e   : > { %v918_v58 = vadd.f32 %v1037_v50, %v907_v54 }
 0x310   : > { %v897_v48 = vpop.xlane.xlu1 %896  ;;  %v881_v49 = vpop.xlane.xlu0 %880  ;;  %923 = vst.msk [vmem:[%s432_s25 + $0x10] sm:$0xff] %vm920_vm1, %v918_v58 }
 0x311   : > { %v905_v51 = vsel %vm904_vm0, %v881_v49, %v897_v48 }
 0x312   : > { %v916_v52 = vadd.f32 %v1037_v50, %v905_v51 }
 0x314   : > { %921 = vst.msk [vmem:[%s432_s25] sm:$0xff] %vm920_vm1, %v916_v52  ;;  %v883_v53 = vpop.xlane.xlu0 %882  ;;  %v887_v59 = vpop.xlane.xlu1 %886 }
 0x318   : > { %v899_v55 = vpop.xlane.xlu0 %898 }
 0x319   : > { %v906_v56 = vsel %vm904_vm0, %v883_v53, %v899_v55 }
 0x31a   : > { %v917_v57 = vadd.f32 %v1037_v50, %v906_v56 }
 0x31c   : > { %922 = vst.msk [vmem:[%s432_s25 + $0x8] sm:$0xff] %vm920_vm1, %v917_v57  ;;  %v903_v60 = vpop.xlane.xlu0 %902 }
 0x31d   : > { %v908_v61 = vsel %vm904_vm0, %v887_v59, %v903_v60 }
 0x31e   : > { %v919_v62 = vadd.f32 %v1037_v50, %v908_v61 }
 0x320   : > { %924 = vst.msk [vmem:[%s432_s25 + $0x18] sm:$0xff] %vm920_vm1, %v919_v62 }
 0x321 PF: > { %s21_s17 = sadd.s32 1, %s1163_s17  }
 0x322   : > { %p18_p4 = scmp.ge.s32.totalorder %s21_s17, 4  }
 0x324   :  { %20 = sbr.rel (!%p18_p4) target bundleno = 1 (0x1), region = 100 }

</bundles_post_ra>
